<compile_context>
chip_gen: v7x
topology: tpu7x:2x2x1
jax: 0.10.0
libtpu: 0.0.40
codegen_flags: <defaults>
</compile_context>

<pallas_src>
import jax
import jax.numpy as jnp
from jax import lax
from jax.experimental import pallas as pl
from jax.experimental.pallas import tpu as pltpu

BN_EPS = 1e-5
_LANE = 128
_TILE_H_CANDIDATES = (512, 384, 256, 128)


def _bn_relu(h, gamma, beta):
    """Training-mode BatchNorm1d (biased batch stats) + ReLU on an f32 (B, T) tile.

    Folded into a single per-feature scale/shift (one fused VPU pass over the
    tile); var = E[h^2] - mean^2 avoids materializing a centered temporary;
    rsqrt goes to the EUP slot.
    """
    mean = jnp.mean(h, axis=0, keepdims=True)
    ex2 = jnp.mean(h * h, axis=0, keepdims=True)
    var = jnp.maximum(ex2 - mean * mean, 0.0)
    scale = gamma * lax.rsqrt(var + BN_EPS)
    shift = beta - mean * scale
    return jnp.maximum(h * scale + shift, 0.0)


def _small_kernel(x_ref, w_ref, gb_ref, o_ref):
    """Full-block fallback for tiny / non-128-multiple hidden sizes."""
    h = jnp.dot(x_ref[...], w_ref[...], preferred_element_type=jnp.float32)
    o_ref[...] = _bn_relu(
        h, gb_ref[0:1, :].astype(jnp.float32),
        gb_ref[1:2, :].astype(jnp.float32)).astype(o_ref.dtype)


def _vmem_capacity_bytes() -> int:
    try:
        return int(pltpu.get_tpu_info().vmem_capacity_bytes)
    except Exception:            # pragma: no cover - query unavailable
        return 64 * 1024 * 1024  # assume the smallest generation (v7x)


def _block_bytes(batch, f_pad, tile_h, itemsize):
    """Per-step VMEM bytes: x single-buffered, everything else double-buffered."""
    return (batch * f_pad * itemsize            # x, resident
            + 2 * f_pad * tile_h * itemsize     # weight tile x2
            + 2 * 2 * tile_h * itemsize         # gamma/beta tile x2
            + 2 * batch * tile_h * itemsize)    # output tile x2


def _pick_tile_h(hidden, f_in, batch, itemsize, budget):
    """Largest lane-aligned H tile dividing `hidden` that fits the VMEM budget."""
    divisors = [t for t in _TILE_H_CANDIDATES if hidden % t == 0]
    for t in divisors:  # largest first
        f_pad = pl.cdiv(f_in, t) * t
        if _block_bytes(batch, f_pad, t, itemsize) <= budget:
            return t
    # Nothing fits: take the smallest lane-aligned tile.
    # TODO(synk): this regime needs the batch-tiled two-pass scheme.
    return divisors[-1]


def residual_forward(x, w, b, gamma, beta):
    """louvergan Residual forward.  x: (B, F_in); w: (F_in, H); b/gamma/beta: (H,).

    Returns (B, H + F_in) = concat([ReLU(BatchNorm1d(x @ w + b)), x], axis=1).
    `b` is accepted for parity with nn.Linear but never shipped to the kernel:
    training-mode BatchNorm subtracts the batch mean, cancelling it exactly.
    """
    del b  # algebraically dead under training-mode BatchNorm
    batch, f_in = x.shape
    hidden = w.shape[1]
    dtype = x.dtype
    itemsize = jnp.dtype(dtype).itemsize
    # gamma/beta as one (2, H) slab -> a single small DMA per grid step.
    gb = jnp.stack([gamma, beta], axis=0).astype(jnp.float32)

    if hidden % _LANE != 0:
        # Tiny / lane-unaligned hidden: one full-block step. The concat stays in
        # the wrapper here: doing it in-kernel would be sub-128-lane masked
        # stores, and at these sizes the extra pass is negligible.
        o = pl.pallas_call(
            _small_kernel,
            out_shape=jax.ShapeDtypeStruct((batch, hidden), dtype),
            grid=(1,),
            in_specs=[
                pl.BlockSpec((batch, f_in), lambda i: (0, 0)),
                pl.BlockSpec((f_in, hidden), lambda i: (0, 0)),
                pl.BlockSpec((2, hidden), lambda i: (0, 0)),
            ],
            out_specs=pl.BlockSpec((batch, hidden), lambda i: (0, 0)),
        )(x, w, gb)
        return jnp.concatenate([o, x], axis=1)

    # ---- lane-aligned hidden: H-tiled kernel, concat fused into the kernel ----
    vmem_cap = _vmem_capacity_bytes()
    tile_h = _pick_tile_h(hidden, f_in, batch, itemsize, budget=int(0.7 * vmem_cap))
    n_h = hidden // tile_h        # grid steps producing o tiles
    n_x = pl.cdiv(f_in, tile_h)   # grid steps copying x into the output tail
    f_pad = n_x * tile_h

    # Zero-pad the contraction dim so the x-tail copy reads whole tiles and the
    # matmul shapes agree; padded rows of w are zero so they contribute nothing.
    x_p = x if f_pad == f_in else jnp.pad(x, ((0, 0), (0, f_pad - f_in)))
    w_p = w if f_pad == f_in else jnp.pad(w, ((0, f_pad - f_in), (0, 0)))

    def kernel(x_ref, w_ref, gb_ref, o_ref):
        j = pl.program_id(0)

        @pl.when(j < n_h)
        def _():
            # Linear tile on the MXU with f32 accumulation (no operand upcast,
            # no bias), then fused BN scale/shift + ReLU in one VPU pass. BN
            # stats reduce only over the batch axis, so per-H-tile stats are
            # exact and no cross-tile reduction is needed.
            h = jnp.dot(x_ref[...], w_ref[...],
                        preferred_element_type=jnp.float32)
            o_ref[...] = _bn_relu(
                h, gb_ref[0:1, :].astype(jnp.float32),
                gb_ref[1:2, :].astype(jnp.float32)).astype(o_ref.dtype)

        @pl.when(j >= n_h)
        def _():
            # Residual passthrough: copy the matching slice of the VMEM-resident
            # x straight into the tail columns of the concatenated output, so no
            # wrapper-side jnp.concatenate (extra HBM pass) is needed.
            if n_x == 1:
                tail = x_ref[...]
            else:
                start = pl.multiple_of((j - n_h) * tile_h, tile_h)
                tail = x_ref[:, pl.ds(start, tile_h)]
            o_ref[...] = tail.astype(o_ref.dtype)

    # Weight / gamma-beta tiles clamp their index on the passthrough steps: same
    # block index as the previous step, so the pipeline issues no extra DMA.
    clamp = lambda j: (0, jnp.minimum(j, n_h - 1))

    need = _block_bytes(batch, f_pad, tile_h, itemsize)
    compiler_params = pltpu.CompilerParams(
        # Every grid step writes a distinct output tile, so the axis is safely
        # "parallel" (megacore sharding on multi-TC chips).
        dimension_semantics=("parallel",),
        vmem_limit_bytes=int(min(0.9 * vmem_cap,
                                 max(2 * need + (4 << 20), 32 << 20))),
    )

    def call(x_pipeline_mode):
        x_kwargs = ({} if x_pipeline_mode is None
                    else {"pipeline_mode": x_pipeline_mode})
        return pl.pallas_call(
            kernel,
            out_shape=jax.ShapeDtypeStruct((batch, hidden + f_in), dtype),
            grid=(n_h + n_x,),
            in_specs=[
                # x: constant block index -> resident in VMEM for every step.
                pl.BlockSpec((batch, f_pad), lambda j: (0, 0), **x_kwargs),
                pl.BlockSpec((f_pad, tile_h), clamp),
                pl.BlockSpec((2, tile_h), clamp),
            ],
            # The last block may be a ragged edge (hidden + f_in need not be a
            # tile_h multiple); the out-of-range columns are masked on writeback.
            out_specs=pl.BlockSpec((batch, tile_h), lambda j: (0, j)),
            compiler_params=compiler_params,
        )(x_p, w_p, gb)

    try:
        # x never changes block index: double-buffering it only doubles its VMEM
        # footprint, so request a single buffer.
        return call(pl.Buffered(1))
    except Exception:  # pragma: no cover - per-arg buffering not supported
        return call(None)


def reference_forward(x, w, b, gamma, beta):
    """Pure-JAX reference of the PyTorch module (training-mode BatchNorm1d)."""
    h = x @ w + b
    mean = jnp.mean(h, axis=0, keepdims=True)
    var = jnp.mean((h - mean) ** 2, axis=0, keepdims=True)
    o = jnp.maximum((h - mean) / jnp.sqrt(var + BN_EPS) * gamma + beta, 0.0)
    return jnp.concatenate([o, x], axis=1)


def _make_inputs(key, batch, f_in, hidden):
    kx, kw, kb, kg, kbe = jax.random.split(key, 5)
    bound = 1.0 / (f_in ** 0.5)
    x = jax.random.normal(kx, (batch, f_in), dtype=jnp.float32)
    w = jax.random.uniform(kw, (f_in, hidden), minval=-bound, maxval=bound,
                           dtype=jnp.float32)
    b = jax.random.uniform(kb, (hidden,), minval=-bound, maxval=bound,
                           dtype=jnp.float32)
    gamma = 1.0 + 0.01 * jax.random.normal(kg, (hidden,), dtype=jnp.float32)
    beta = 0.01 * jax.random.normal(kbe, (hidden,), dtype=jnp.float32)
    return x, w, b, gamma, beta


if __name__ == "__main__":
    key = jax.random.PRNGKey(0)
    cases = [
        (8, 16, 32),     # spec-sized: Residual(in_features=16, hidden_features=32)
        (8, 256, 256),   # lane-aligned path, exact tiles (no padding / ragged edge)
        (16, 300, 640),  # lane-aligned path, several H tiles + padded/ragged x tail
    ]
    for idx, (batch, f_in, hidden) in enumerate(cases):
        key, sub = jax.random.split(key)
        x, w, b, gamma, beta = _make_inputs(sub, batch, f_in, hidden)
        out = jax.block_until_ready(residual_forward(x, w, b, gamma, beta))
        ref = reference_forward(x, w, b, gamma, beta)
        assert out.shape == (batch, hidden + f_in), f"bad shape in case {idx}"
        # Tolerance covers MXU f32-emulation / accumulation-order differences
        # while still catching any structural or BatchNorm bug.
        assert jnp.allclose(out, ref, atol=2e-4, rtol=2e-4), f"mismatch in case {idx}"
    print("KERNEL_OK")
</pallas_src>

<mosaic_0001>
module attributes {stable_mosaic.version = 11 : i64} {
  func.func @_small_kernel(%arg0: i32, %arg1: memref<8x16xf32, #tpu.memory_space<vmem>>, %arg2: memref<16x32xf32, #tpu.memory_space<vmem>>, %arg3: memref<2x32xf32, #tpu.memory_space<vmem>>, %arg4: memref<8x32xf32, #tpu.memory_space<vmem>>) attributes {dimension_semantics = [#tpu.dimension_semantics<arbitrary>], iteration_bounds = array<i64: 1>, scalar_prefetch = 0 : i64, scratch_operands = 0 : i64, tpu.core_type = #tpu.core_type<tc>, window_params = [{pipeline_mode = #tpu.pipeline_mode<synchronous>, transform_indices = @transform_0, window_bounds = array<i64: 8, 16>}, {pipeline_mode = #tpu.pipeline_mode<synchronous>, transform_indices = @transform_1, window_bounds = array<i64: 16, 32>}, {pipeline_mode = #tpu.pipeline_mode<synchronous>, transform_indices = @transform_2, window_bounds = array<i64: 2, 32>}, {pipeline_mode = #tpu.pipeline_mode<synchronous>, transform_indices = @transform_3, window_bounds = array<i64: 8, 32>}]} {
    %c0 = arith.constant 0 : index
    %c0_0 = arith.constant 0 : index
    %0 = vector.load %arg1[%c0, %c0_0] : memref<8x16xf32, #tpu.memory_space<vmem>>, vector<8x16xf32>
    %c0_1 = arith.constant 0 : index
    %c0_2 = arith.constant 0 : index
    %1 = vector.load %arg2[%c0_1, %c0_2] : memref<16x32xf32, #tpu.memory_space<vmem>>, vector<16x32xf32>
    %cst = arith.constant dense<0.000000e+00> : vector<8x32xf32>
    %2 = tpu.matmul %0, %1, %cst {dimension_numbers = #tpu.dot_dimension_numbers<[1], [0], [0], [1], [0, 0, 1, 1], [], []>} : vector<8x16xf32>, vector<16x32xf32>, vector<8x32xf32> -> vector<8x32xf32>
    %c0_3 = arith.constant 0 : index
    %c0_4 = arith.constant 0 : index
    %3 = vector.load %arg3[%c0_3, %c0_4] : memref<2x32xf32, #tpu.memory_space<vmem>>, vector<1x32xf32>
    %c1 = arith.constant 1 : index
    %c0_5 = arith.constant 0 : index
    %4 = vector.load %arg3[%c1, %c0_5] : memref<2x32xf32, #tpu.memory_space<vmem>>, vector<1x32xf32>
    %cst_6 = arith.constant dense<0.000000e+00> : vector<32xf32>
    %5 = vector.multi_reduction <add>, %2, %cst_6 [0] : vector<8x32xf32> to vector<32xf32>
    %6 = vector.shape_cast %5 : vector<32xf32> to vector<1x32xf32>
    %cst_7 = arith.constant 8.000000e+00 : f32
    %7 = vector.broadcast %cst_7 : f32 to vector<1x32xf32>
    %8 = arith.divf %6, %7 : vector<1x32xf32>
    %9 = arith.mulf %2, %2 : vector<8x32xf32>
    %cst_8 = arith.constant dense<0.000000e+00> : vector<32xf32>
    %10 = vector.multi_reduction <add>, %9, %cst_8 [0] : vector<8x32xf32> to vector<32xf32>
    %11 = vector.shape_cast %10 : vector<32xf32> to vector<1x32xf32>
    %cst_9 = arith.constant 8.000000e+00 : f32
    %12 = vector.broadcast %cst_9 : f32 to vector<1x32xf32>
    %13 = arith.divf %11, %12 : vector<1x32xf32>
    %14 = arith.mulf %8, %8 : vector<1x32xf32>
    %15 = arith.subf %13, %14 : vector<1x32xf32>
    %cst_10 = arith.constant 0.000000e+00 : f32
    %16 = vector.broadcast %cst_10 : f32 to vector<1x32xf32>
    %17 = arith.maximumf %15, %16 : vector<1x32xf32>
    %cst_11 = arith.constant 9.99999974E-6 : f32
    %18 = vector.broadcast %cst_11 : f32 to vector<1x32xf32>
    %19 = arith.addf %17, %18 : vector<1x32xf32>
    %20 = math.rsqrt %19 : vector<1x32xf32>
    %21 = arith.mulf %3, %20 : vector<1x32xf32>
    %22 = arith.mulf %8, %21 : vector<1x32xf32>
    %23 = arith.subf %4, %22 : vector<1x32xf32>
    %24 = vector.broadcast %21 : vector<1x32xf32> to vector<8x32xf32>
    %25 = arith.mulf %2, %24 : vector<8x32xf32>
    %26 = vector.broadcast %23 : vector<1x32xf32> to vector<8x32xf32>
    %27 = arith.addf %25, %26 : vector<8x32xf32>
    %cst_12 = arith.constant 0.000000e+00 : f32
    %28 = vector.broadcast %cst_12 : f32 to vector<8x32xf32>
    %29 = arith.maximumf %27, %28 : vector<8x32xf32>
    %c0_13 = arith.constant 0 : index
    %c0_14 = arith.constant 0 : index
    %30 = vector.load %arg4[%c0_13, %c0_14] : memref<8x32xf32, #tpu.memory_space<vmem>>, vector<8x32xf32>
    tpu.vector_store %arg4[%c0_13, %c0_14], %29 {strides = array<i32>} : memref<8x32xf32, #tpu.memory_space<vmem>>, vector<8x32xf32>,
    return
  }
  func.func @transform_0(%arg0: i32) -> (i32, i32) {
    %c0_i32 = arith.constant 0 : i32
    %c0_i32_0 = arith.constant 0 : i32
    %c0_i32_1 = arith.constant 0 : i32
    return %c0_i32, %c0_i32_0 : i32, i32
  }
  func.func @transform_1(%arg0: i32) -> (i32, i32) {
    %c0_i32 = arith.constant 0 : i32
    %c0_i32_0 = arith.constant 0 : i32
    %c0_i32_1 = arith.constant 0 : i32
    return %c0_i32, %c0_i32_0 : i32, i32
  }
  func.func @transform_2(%arg0: i32) -> (i32, i32) {
    %c0_i32 = arith.constant 0 : i32
    %c0_i32_0 = arith.constant 0 : i32
    %c0_i32_1 = arith.constant 0 : i32
    return %c0_i32, %c0_i32_0 : i32, i32
  }
  func.func @transform_3(%arg0: i32) -> (i32, i32) {
    %c0_i32 = arith.constant 0 : i32
    %c0_i32_0 = arith.constant 0 : i32
    %c0_i32_1 = arith.constant 0 : i32
    return %c0_i32, %c0_i32_0 : i32, i32
  }
}

</mosaic_0001>

<bundles_post_ra>
// kernel: tpu_custom_call.1
= control target key start
LH: loop header
LB: loop body
LE: loop exit
PB: predicated region body
PF: predicated region fallthrough
CT: control target
= control target key end

     0   :  { %8 = vsyncpa [#allocation3], 0  ;;  %s351_s0 = inlined_call_operand.hbm [shape: f32[8,16], index: 0, kind: input, shape index: {}]   ;;  %s352_s1 = inlined_call_operand.hbm [shape: f32[16,32], index: 1, kind: input, shape index: {}]   ;;  %s353_s2 = inlined_call_operand.vmem [shape: f32[2,32], index: 2, kind: input, shape index: {}]   ;;  %s354_s3 = inlined_call_operand.hbm [shape: f32[8,32], index: 3, kind: output, shape index: {}]  }
   0x1   :  { %9 = vsyncpa [#allocation6], 0 }
   0x2   :  { %10 = vsyncpa [#allocation4], 0  ;;  %s271_s12 = smov [#allocation2]   ;;  %s272_s14 = smov [#allocation5]  }
   0x3   :  { %s17_s13 = sshll.u32 %s271_s12, 4  ;;  %s26_s15 = sshll.u32 %s272_s14, 4  ;;  %s18_s13 = int_to_ptr.vmem [resolvable:$true] %s17_s13  ;;  %s299_s15 = int_to_ptr.vmem [resolvable:$true] %s26_s15 }
   0x4   :  { %s199_s18 = scalar_lea.hbm %s351_s0, 128 }
   0x5   :  { %p200_p0 = scmp.ne.s32.totalorder %s351_s0, %s199_s18  ;;  %p203_p1 = scmp.lt.u32.totalorder %s199_s18, %s351_s0 }
   0x7   :  { %p205_p2 = pnand %p203_p1, %p200_p0 }
   0x9   :  { %208 = shalt.err (!%p205_p2)
}
   0xa   :  { %s209_s23 = scalar_lea.vmem %s18_s13, 128  ;;  %p214_p4 = scmp.lt.s32.totalorder %s18_s13, %s18_s13 }
   0xb   :  { %p210_p3 = scmp.ne.s32.totalorder %s18_s13, %s209_s23  ;;  %p215_p5 = scmp.lt.s32.totalorder %s209_s23, %s209_s23 }
   0xd   :  { %p216_p6 = por %p215_p5, %p214_p4 }
   0xf   :  { %p217_p7 = pnand %p216_p6, %p210_p3 }
  0x11   :  { %220 = shalt.err (!%p217_p7)
}
  0x12   :  { %20 = dma.hbm_to_vmem [thread:$0]  %s351_s0, 128, %s18_s13, [#allocation3]  }
  0x13   :  { %s221_s28 = scalar_lea.hbm %s352_s1, 256 }
  0x14   :  { %p222_p8 = scmp.ne.s32.totalorder %s352_s1, %s221_s28  ;;  %p225_p9 = scmp.lt.u32.totalorder %s221_s28, %s352_s1 }
  0x16   :  { %p227_p10 = pnand %p225_p9, %p222_p8 }
  0x18   :  { %230 = shalt.err (!%p227_p10)
}
  0x19   :  { %s231_s6 = scalar_lea.vmem %s299_s15, 256  ;;  %p236_p12 = scmp.lt.s32.totalorder %s299_s15, %s299_s15 }
  0x1a   :  { %p232_p11 = scmp.ne.s32.totalorder %s299_s15, %s231_s6  ;;  %p237_p13 = scmp.lt.s32.totalorder %s231_s6, %s231_s6 }
  0x1c   :  { %p238_p0 = por %p237_p13, %p236_p12 }
  0x1e   :  { %p239_p1 = pnand %p238_p0, %p232_p11 }
  0x20   :  { %242 = shalt.err (!%p239_p1)
}
  0x21   :  { %s273_s0 = smov 128   ;;  %s274_s7 = smov 8  }
  0x22   :  { %32 = dma.hbm_to_vmem [thread:$0]  %s352_s1, 256, %s299_s15, [#allocation6], %s273_s0, %s273_s0, %s274_s7  }
  0x23   :  { %265 = dma.done.wait [#allocation3], 128  }
  0x24   :  { %266 = vsyncadd [#allocation3], 4294967168 }
  0x25   :  { %267 = dma.done.wait [#allocation6], 256  }
  0x26   :  { %268 = vsyncadd [#allocation6], 4294967040  ;;  %v275_v0 = vmov 0.0|0.0   ;;  %vm276_vm0 = vmmov 0   ;;  %v277_v1 = vmov 0.0   ;;  %v42_v2 = vld [vmem:[#allocation5] sm:$0xff]  ;;  %v147_v29 = vlaneseq }
  0x27   :  { %186 = vmatprep.subr.bf16.mxu0 %v275_v0  ;;  %183 = vmatprep.mubr.msk.f32.mxu0 %vm276_vm0, %v277_v1  ;;  %v43_v3 = vld [vmem:[#allocation5 + $0x8] sm:$0xff]  ;;  %v41_v5 = vld [vmem:[#allocation2] sm:$0xff]  ;;  %vm44_vm1 = vcmask 130048   ;;  %vm120_vm2 = vcmask 261120   ;;  %s278_s13 = smov [#allocation7]  }
  0x28   :  { %v187_v4 = vpack.c.bf16 %v43_v3, %v42_v2  ;;  %v148_v30 = vshrl.u32 %v147_v29, 7  ;;  %v118_v31 = vld [vmem:[%s353_s2] sm:$0x1]  ;;  %v119_v35 = vld [vmem:[%s353_s2 + $0x1] sm:$0x1]  ;;  %s165_s14 = sshll.u32 %s278_s13, 4  ;;  %s166_s14 = int_to_ptr.vmem [resolvable:$true] %s165_s14 }
  0x29   :  { %s243_s15 = scalar_lea.vmem %s166_s14, 128  ;;  %p248_p3 = scmp.lt.s32.totalorder %s166_s14, %s166_s14 }
  0x2a   :  { %188 = vmatpush3.bf16.msra.mxu0 %v187_v4  ;;  %v149_v32 = vsub.s32 0, %v148_v30  ;;  %p244_p2 = scmp.ne.s32.totalorder %s166_s14, %s243_s15  ;;  %p249_p4 = scmp.lt.s32.totalorder %s243_s15, %s243_s15 }
  0x2c   :  { %p250_p5 = por %p249_p4, %p248_p3 }
  0x2d   :  { %184 = vmatmul.mubr.msk.f32.vlgmr.msra.gmra.mrb[0].mxu0 %vm44_vm1, %v41_v5 }
  0x2e   :  { %p251_p6 = pnand %p250_p5, %p244_p2 }
 0x100   :  { %v114_v6 = vpop.f32.mrb[0].mxu0 }
 0x101   :  { %v121_v7 = vsel %vm120_vm2, %v114_v6, 0.0  ;;  %v130_v8 = vmul.f32 %v114_v6, %v114_v6  ;;  %v185_v9 = vpop.f32.mrb[1].mxu0 }
 0x102   :  { %v122_v10 = vrot.slane %v121_v7, 4 }
 0x103   :  { %v131_v11 = vsel %vm120_vm2, %v130_v8, 0.0 }
 0x104   :  { %v123_v12 = vadd.f32 %v122_v10, %v121_v7  ;;  %v132_v13 = vrot.slane %v131_v11, 4 }
 0x106   :  { %v124_v14 = vrot.slane %v123_v12, 2  ;;  %v133_v15 = vadd.f32 %v132_v13, %v131_v11 }
 0x108   :  { %v125_v16 = vadd.f32 %v124_v14, %v123_v12  ;;  %v134_v17 = vrot.slane %v133_v15, 2 }
 0x10a   :  { %v126_v18 = vrot.slane %v125_v16, 1  ;;  %v135_v19 = vadd.f32 %v134_v17, %v133_v15 }
 0x10c   :  { %v127_v20 = vadd.f32 %v126_v18, %v125_v16  ;;  %v136_v21 = vrot.slane %v135_v19, 1 }
 0x10e   :  { %v129_v22 = vmul.f32 0.125, %v127_v20  ;;  %v137_v23 = vadd.f32 %v136_v21, %v135_v19 }
 0x110   :  { %v138_v24 = vmul.f32 0.125, %v137_v23  ;;  %v139_v25 = vmul.f32 %v129_v22, %v129_v22 }
 0x112   :  { %v140_v26 = vsub.f32 %v138_v24, %v139_v25 }
 0x114   :  { %v141_v27 = vmax.f32 %v140_v26, 0.0 }
 0x116   :  { %v142_v28 = vadd.f32 1e-05, %v141_v27 }
 0x118   :  { %197 = vrsqrt.f32 %v142_v28 }
 0x122   :  { %v198_v33 = vpop.eup %197 }
 0x123   :  { %v144_v34 = vmul.f32 %v198_v33, %v118_v31 }
 0x125   :  { %v145_v36 = vmul.f32 %v144_v34, %v129_v22  ;;  %v150_v37 = vrot.slane %v144_v34, %v149_v32 }
 0x127   :  { %v146_v38 = vsub.f32 %v119_v35, %v145_v36  ;;  %v151_v39 = vmul.f32 %v150_v37, %v114_v6 }
 0x129   :  { %v155_v40 = vrot.slane %v146_v38, %v149_v32 }
 0x12b   :  { %v156_v41 = vadd.f32 %v155_v40, %v151_v39 }
 0x12d   :  { %v157_v42 = vmax.f32 %v156_v41, 0.0 }
 0x12f   :  { %158 = vst.msk [vmem:[#allocation7] sm:$0xff] %vm120_vm2, %v157_v42 }
 0x130   :  { %254 = shalt.err (!%p251_p6)
}
 0x131   :  { %s255_s17 = scalar_lea.hbm %s354_s3, 128 }
 0x132   :  { %p256_p7 = scmp.ne.s32.totalorder %s354_s3, %s255_s17  ;;  %p259_p8 = scmp.lt.u32.totalorder %s255_s17, %s354_s3 }
 0x134   :  { %p261_p9 = pnand %p259_p8, %p256_p7 }
 0x136   :  { %264 = shalt.err (!%p261_p9)
}
 0x137   :  { %168 = dma.vmem_to_hbm [thread:$0]  %s166_s14, 128, %s354_s3, [#allocation4]  }
 0x138   :  { %269 = dma.done.wait [#allocation4], 128  }
 0x139   :  { %270 = vsyncadd [#allocation4], 4294967168 }
 0x13a   :  { %172 = vsyncpa [#allocation3], 1 }
 0x13b   :  { %173 = vsyncpa [#allocation6], 1 }
 0x13c   :  { %174 = vsyncpa [#allocation4], 1 }

</bundles_post_ra>
